<compile_context>
chip_gen: v7x
topology: tpu7x:2x2x1
jax: 0.10.0
libtpu: 0.0.40
codegen_flags: <defaults>
</compile_context>

<pallas_src>
import jax
import jax.numpy as jnp
from jax.experimental import pallas as pl
from jax.experimental.pallas import tpu as pltpu


def _round_up(n, m):
    return ((n + m - 1) // m) * m


def _vmem_limit_bytes():
    """Generation-aware VMEM limit, leaving headroom for compiler scratch."""
    phys = None
    try:
        info = pltpu.get_tpu_info()
        phys = getattr(info, "vmem_capacity_bytes", None)
    except Exception:
        phys = None
    if not phys or phys <= 0:
        phys = 64 * 1024 * 1024          # conservative fallback: v7x per-TensorCore VMEM
    return int(phys * 0.85)              # ~54 MiB on v7x, ~109 MiB on v5e/v6e


def _step_vmem_bytes(tb, s_pad, d, h, itemsize):
    """Conservative per-grid-step VMEM footprint (includes lane/sublane padding)."""
    d_pad = _round_up(max(d, 1), 128)
    h_pad = _round_up(max(h, 1), 128)
    s_lane = _round_up(max(s_pad, 1), 128)
    tb_pad = _round_up(tb, 8)
    x_blk = tb_pad * s_pad * d_pad * itemsize
    mask_blk = tb_pad * s_lane * itemsize
    out_blk = tb_pad * d_pad * itemsize
    e_tmp = tb_pad * s_pad * h_pad * 4                 # f32 hidden activations
    weights = d_pad * h_pad * itemsize + 2 * 8 * h_pad * 4 + 8 * 128 * 4
    # x / mask / out are double-buffered; weights are single-buffered (pl.Buffered(1)).
    return 2 * (x_blk + mask_blk + out_blk) + e_tmp + weights


def _pick_batch_tile(b_pad, s_pad, d, h, itemsize, vmem_budget):
    """Largest multiple-of-8 divisor of the (padded) batch whose per-step footprint fits
    the VMEM budget; stop growing once the x block passes ~2 MiB (per-step DMA overhead
    is already amortized by then)."""
    d_pad = _round_up(max(d, 1), 128)
    divisors = [t for t in range(8, b_pad + 1, 8) if b_pad % t == 0] or [b_pad]
    best = divisors[0]
    for t in divisors:
        if _step_vmem_bytes(t, s_pad, d, h, itemsize) > vmem_budget:
            break
        best = t
        if t * s_pad * d_pad * itemsize >= (2 << 20):
            break
    # Keep at least two grid steps when possible (megacore sharding + pipelining).
    if best == b_pad and b_pad >= 16:
        smaller = [t for t in divisors if t <= b_pad // 2]
        if smaller:
            best = smaller[-1]
    return best
    # TODO(synk): if even tb=8 cannot fit VMEM (very large S*D), add a second grid axis
    # over S with an online-softmax accumulator instead of shrinking tb further.


def _additive_attention_kernel(x_ref, mask_ref, w1_ref, b1_ref, w2_ref, b2_ref, o_ref):
    tb, S, D = x_ref.shape
    H = w1_ref.shape[1]

    x = x_ref[...]                                    # (TB, S, D)
    mask = mask_ref[...]                              # (TB, S)  lane-dense

    # --- hidden projection: the one large MXU matmul, on the flattened block ---
    # x2d follows w1's dtype so the wrapper can feed bf16 MXU operands; accumulation is f32.
    x2d = x.reshape(tb * S, D).astype(w1_ref.dtype)
    e = jnp.tanh(
        jnp.dot(x2d, w1_ref[...], preferred_element_type=jnp.float32) + b1_ref[...]
    )                                                 # (TB*S, H) f32
    # TODO(synk): on v6e/v7x the tanh (and e) could run in bf16 on the EUP; kept f32 so the
    # demo matches the PyTorch reference tightly and stays correct on v5e (no bf16 VPU/EUP).

    # --- score projection: N=1 matmul on the MXU (cheap there; keeps VALU/EUP slots free) ---
    scores = jnp.dot(e, w2_ref[...], preferred_element_type=jnp.float32)   # (TB*S, 1)
    scores = scores.reshape(tb, S) + b2_ref[0, 0]     # lane-dense (TB, S)

    # exp with per-row max subtraction (invariant under the normalization; the epsilon is
    # rescaled so the result matches the un-shifted reference, and masked inf*0 NaNs
    # cannot occur).
    m = jnp.max(scores, axis=-1, keepdims=True)                           # (TB, 1)
    alpha = jnp.exp(scores - m) * mask                                    # (TB, S)
    denom = jnp.sum(alpha, axis=-1, keepdims=True) + 1e-08 * jnp.exp(-m)  # (TB, 1)

    # --- weighted pooling on the VPU (avoids an M=1 MXU matmul); normalize after pooling ---
    pooled = jnp.sum(alpha[:, :, None] * x, axis=1)                       # (TB, D)
    # approx=True would ride the EUP for free but costs ~1e-3 relative error.
    pooled = pooled * pl.reciprocal(denom, approx=False)
    o_ref[...] = pooled.astype(o_ref.dtype)


def additive_attention(x, attn_mask, w1, b1, w2, b2, *, tb=None, use_bf16=False):
    """x: (B, S, D); attn_mask: (B, S); w1: (D, H); b1: (1, H); w2: (H, 1); b2: (1, 1)."""
    B, S, D = x.shape
    H = w1.shape[1]

    # --- wrapper-side layout plumbing (cheap XLA ops; keeps the kernel relayout-free) ---
    s_pad = _round_up(S, 8)             # sublane-aligned seq -> layout-free in-kernel reshape
    b_pad = _round_up(B, 8)             # batch tile must be a multiple of 8
    mask = attn_mask.astype(x.dtype)    # (B, S) lane-dense (a size-1 last dim would pad 128x)
    if s_pad != S:
        x = jnp.pad(x, ((0, 0), (0, s_pad - S), (0, 0)))
        mask = jnp.pad(mask, ((0, 0), (0, s_pad - S)))
    if b_pad != B:
        x = jnp.pad(x, ((0, b_pad - B), (0, 0), (0, 0)))
        mask = jnp.pad(mask, ((0, b_pad - B), (0, 0)))

    w1_in = w1.astype(jnp.bfloat16) if use_bf16 else w1   # kernel matches x2d to w1's dtype
    b1_row = b1.reshape(1, H)
    w2_col = w2.reshape(H, 1)           # column vector: score projection stays on the MXU
    b2_s = b2.reshape(1, 1)             # single scalar -> SMEM

    itemsize = jnp.dtype(x.dtype).itemsize
    vmem_limit = _vmem_limit_bytes()
    if tb is None or b_pad % tb != 0 or (tb % 8 != 0 and tb != b_pad):
        tb = _pick_batch_tile(b_pad, s_pad, D, H, itemsize, vmem_limit)

    out = pl.pallas_call(
        _additive_attention_kernel,
        out_shape=jax.ShapeDtypeStruct((b_pad, D), x.dtype),
        grid_spec=pltpu.PrefetchScalarGridSpec(
            num_scalar_prefetch=0,
            grid=(b_pad // tb,),
            in_specs=[
                pl.BlockSpec((tb, s_pad, D), lambda b: (b, 0, 0)),       # x
                pl.BlockSpec((tb, s_pad), lambda b: (b, 0)),             # mask, lane-dense
                pl.BlockSpec((D, H), lambda b: (0, 0),
                             pipeline_mode=pl.Buffered(1)),              # w1 (grid-invariant)
                pl.BlockSpec((1, H), lambda b: (0, 0),
                             pipeline_mode=pl.Buffered(1)),              # b1 (grid-invariant)
                pl.BlockSpec((H, 1), lambda b: (0, 0),
                             pipeline_mode=pl.Buffered(1)),              # w2 (grid-invariant)
                pl.BlockSpec(memory_space=pltpu.MemorySpace.SMEM),       # b2 scalar in SMEM
            ],
            out_specs=pl.BlockSpec((tb, D), lambda b: (b, 0)),           # sublane-dense store
        ),
        compiler_params=pltpu.CompilerParams(
            dimension_semantics=("parallel",),        # shard batch blocks across cores (v7x)
            vmem_limit_bytes=vmem_limit,              # generation-aware, not a hard-coded 64 MiB
        ),
    )(x, mask, w1_in, b1_row, w2_col, b2_s)

    return out[:B] if b_pad != B else out


def _reference(x, attn_mask, w1, b1, w2, b2):
    # Pure-JAX reference mirroring the PyTorch forward exactly.
    e = jnp.tanh(x @ w1 + b1)                          # (B, S, H)
    alpha = jnp.exp(e @ w2 + b2)                       # (B, S, 1)
    alpha = alpha * attn_mask[:, :, None]
    alpha = alpha / (jnp.sum(alpha, axis=1, keepdims=True) + 1e-08)
    return jnp.einsum("bsd,bso->bd", x, alpha)         # == bmm(x^T, alpha).reshape(B, -1)


if __name__ == "__main__":
    # Small test shapes: batch=16 so the auto-picked batch tile (8) gives a 2-step grid.
    B, S, D, H = 16, 8, 32, 32

    key = jax.random.PRNGKey(0)
    kx, kmask, kw1, kb1, kw2, kb2 = jax.random.split(key, 6)

    x = jax.random.normal(kx, (B, S, D), dtype=jnp.float32)
    attn_mask = (jax.random.uniform(kmask, (B, S)) > 0.3).astype(jnp.float32)

    # Deterministic parameter init (shapes from nn.Linear(d_h, hidden), nn.Linear(hidden, 1)).
    w1 = jax.random.normal(kw1, (D, H), dtype=jnp.float32) * 0.1
    b1 = jax.random.normal(kb1, (1, H), dtype=jnp.float32) * 0.1
    w2 = jax.random.normal(kw2, (H, 1), dtype=jnp.float32) * 0.1
    b2 = jax.random.normal(kb2, (1, 1), dtype=jnp.float32) * 0.1

    out = additive_attention(x, attn_mask, w1, b1, w2, b2)
    out = jax.block_until_ready(out)

    ref = _reference(x, attn_mask, w1, b1, w2, b2)
    assert out.shape == (B, D)
    assert jnp.allclose(out, ref, atol=5e-5, rtol=5e-5), "mismatch vs reference"

    print("KERNEL_OK")
</pallas_src>

<mosaic_0001>
module attributes {stable_mosaic.version = 11 : i64} {
  func.func @_additive_attention_kernel(%arg0: i32, %arg1: memref<8x8x32xf32, #tpu.memory_space<vmem>>, %arg2: memref<8x8xf32, #tpu.memory_space<vmem>>, %arg3: memref<32x32xf32, #tpu.memory_space<vmem>>, %arg4: memref<1x32xf32, #tpu.memory_space<vmem>>, %arg5: memref<32x1xf32, #tpu.memory_space<vmem>>, %arg6: memref<1x1xf32, #tpu.memory_space<smem>>, %arg7: memref<8x32xf32, #tpu.memory_space<vmem>>) attributes {dimension_semantics = [#tpu.dimension_semantics<parallel>], iteration_bounds = array<i64: 2>, scalar_prefetch = 0 : i64, scratch_operands = 0 : i64, tpu.core_type = #tpu.core_type<tc>, window_params = [{transform_indices = @transform_0, window_bounds = array<i64: 8, 8, 32>}, {transform_indices = @transform_1, window_bounds = array<i64: 8, 8>}, {pipeline_mode = #tpu.pipeline_mode<synchronous>, transform_indices = @transform_2, window_bounds = array<i64: 32, 32>}, {pipeline_mode = #tpu.pipeline_mode<synchronous>, transform_indices = @transform_3, window_bounds = array<i64: 1, 32>}, {pipeline_mode = #tpu.pipeline_mode<synchronous>, transform_indices = @transform_4, window_bounds = array<i64: 32, 1>}, {transform_indices = @transform_5, window_bounds = array<i64: 1, 1>}, {transform_indices = @transform_6, window_bounds = array<i64: 8, 32>}]} {
    %c0 = arith.constant 0 : index
    %c0_0 = arith.constant 0 : index
    %c0_1 = arith.constant 0 : index
    %0 = vector.load %arg1[%c0, %c0_0, %c0_1] : memref<8x8x32xf32, #tpu.memory_space<vmem>>, vector<8x8x32xf32>
    %c0_2 = arith.constant 0 : index
    %c0_3 = arith.constant 0 : index
    %1 = vector.load %arg2[%c0_2, %c0_3] : memref<8x8xf32, #tpu.memory_space<vmem>>, vector<8x8xf32>
    %2 = vector.shape_cast %0 : vector<8x8x32xf32> to vector<64x32xf32>
    %c0_4 = arith.constant 0 : index
    %c0_5 = arith.constant 0 : index
    %3 = vector.load %arg3[%c0_4, %c0_5] : memref<32x32xf32, #tpu.memory_space<vmem>>, vector<32x32xf32>
    %cst = arith.constant dense<0.000000e+00> : vector<64x32xf32>
    %4 = tpu.matmul %2, %3, %cst {dimension_numbers = #tpu.dot_dimension_numbers<[1], [0], [0], [1], [0, 0, 1, 1], [], []>} : vector<64x32xf32>, vector<32x32xf32>, vector<64x32xf32> -> vector<64x32xf32>
    %c0_6 = arith.constant 0 : index
    %c0_7 = arith.constant 0 : index
    %5 = vector.load %arg4[%c0_6, %c0_7] : memref<1x32xf32, #tpu.memory_space<vmem>>, vector<1x32xf32>
    %6 = vector.broadcast %5 : vector<1x32xf32> to vector<64x32xf32>
    %7 = arith.addf %4, %6 : vector<64x32xf32>
    %8 = math.tanh %7 : vector<64x32xf32>
    %c0_8 = arith.constant 0 : index
    %c0_9 = arith.constant 0 : index
    %9 = vector.load %arg5[%c0_8, %c0_9] : memref<32x1xf32, #tpu.memory_space<vmem>>, vector<32x1xf32>
    %cst_10 = arith.constant dense<0.000000e+00> : vector<64x1xf32>
    %10 = tpu.matmul %8, %9, %cst_10 {dimension_numbers = #tpu.dot_dimension_numbers<[1], [0], [0], [1], [0, 0, 1, 1], [], []>} : vector<64x32xf32>, vector<32x1xf32>, vector<64x1xf32> -> vector<64x1xf32>
    %11 = vector.shape_cast %10 : vector<64x1xf32> to vector<8x8xf32>
    %c0_11 = arith.constant 0 : index
    %c0_12 = arith.constant 0 : index
    %12 = memref.load %arg6[%c0_11, %c0_12] : memref<1x1xf32, #tpu.memory_space<smem>>
    %13 = vector.broadcast %12 : f32 to vector<8x8xf32>
    %14 = arith.addf %11, %13 : vector<8x8xf32>
    %cst_13 = arith.constant dense<0xFF800000> : vector<8xf32>
    %15 = vector.multi_reduction <maximumf>, %14, %cst_13 [1] : vector<8x8xf32> to vector<8xf32>
    %16 = vector.shape_cast %15 : vector<8xf32> to vector<8x1xf32>
    %17 = vector.broadcast %16 : vector<8x1xf32> to vector<8x8xf32>
    %18 = arith.subf %14, %17 : vector<8x8xf32>
    %19 = math.exp %18 : vector<8x8xf32>
    %20 = arith.mulf %19, %1 : vector<8x8xf32>
    %cst_14 = arith.constant dense<0.000000e+00> : vector<8xf32>
    %21 = vector.multi_reduction <add>, %20, %cst_14 [1] : vector<8x8xf32> to vector<8xf32>
    %22 = vector.shape_cast %21 : vector<8xf32> to vector<8x1xf32>
    %cst_15 = arith.constant 0.000000e+00 : f32
    %23 = vector.broadcast %cst_15 : f32 to vector<8x1xf32>
    %24 = arith.subf %23, %16 : vector<8x1xf32>
    %25 = math.exp %24 : vector<8x1xf32>
    %cst_16 = arith.constant 9.99999993E-9 : f32
    %26 = vector.broadcast %cst_16 : f32 to vector<8x1xf32>
    %27 = arith.mulf %26, %25 : vector<8x1xf32>
    %28 = arith.addf %22, %27 : vector<8x1xf32>
    %29 = vector.shape_cast %20 : vector<8x8xf32> to vector<8x8x1xf32>
    %30 = vector.broadcast %29 : vector<8x8x1xf32> to vector<8x8x32xf32>
    %31 = arith.mulf %30, %0 : vector<8x8x32xf32>
    %cst_17 = arith.constant dense<0.000000e+00> : vector<8x32xf32>
    %32 = vector.multi_reduction <add>, %31, %cst_17 [1] : vector<8x8x32xf32> to vector<8x32xf32>
    %33 = tpu.reciprocal %28 : vector<8x1xf32> -> vector<8x1xf32>
    %34 = vector.broadcast %33 : vector<8x1xf32> to vector<8x32xf32>
    %35 = arith.mulf %32, %34 : vector<8x32xf32>
    %c0_18 = arith.constant 0 : index
    %c0_19 = arith.constant 0 : index
    %36 = vector.load %arg7[%c0_18, %c0_19] : memref<8x32xf32, #tpu.memory_space<vmem>>, vector<8x32xf32>
    tpu.vector_store %arg7[%c0_18, %c0_19], %35 {strides = array<i32>} : memref<8x32xf32, #tpu.memory_space<vmem>>, vector<8x32xf32>,
    return
  }
  func.func @transform_0(%arg0: i32) -> (i32, i32, i32) {
    %c0_i32 = arith.constant 0 : i32
    %c0_i32_0 = arith.constant 0 : i32
    %c0_i32_1 = arith.constant 0 : i32
    return %arg0, %c0_i32, %c0_i32_0 : i32, i32, i32
  }
  func.func @transform_1(%arg0: i32) -> (i32, i32) {
    %c0_i32 = arith.constant 0 : i32
    %c0_i32_0 = arith.constant 0 : i32
    return %arg0, %c0_i32 : i32, i32
  }
  func.func @transform_2(%arg0: i32) -> (i32, i32) {
    %c0_i32 = arith.constant 0 : i32
    %c0_i32_0 = arith.constant 0 : i32
    %c0_i32_1 = arith.constant 0 : i32
    return %c0_i32, %c0_i32_0 : i32, i32
  }
  func.func @transform_3(%arg0: i32) -> (i32, i32) {
    %c0_i32 = arith.constant 0 : i32
    %c0_i32_0 = arith.constant 0 : i32
    %c0_i32_1 = arith.constant 0 : i32
    return %c0_i32, %c0_i32_0 : i32, i32
  }
  func.func @transform_4(%arg0: i32) -> (i32, i32) {
    %c0_i32 = arith.constant 0 : i32
    %c0_i32_0 = arith.constant 0 : i32
    %c0_i32_1 = arith.constant 0 : i32
    return %c0_i32, %c0_i32_0 : i32, i32
  }
  func.func @transform_5(%arg0: i32) -> (i32, i32) {
    %c0_i32 = arith.constant 0 : i32
    %c0_i32_0 = arith.constant 0 : i32
    %c0_i32_1 = arith.constant 0 : i32
    return %c0_i32, %c0_i32_0 : i32, i32
  }
  func.func @transform_6(%arg0: i32) -> (i32, i32) {
    %c0_i32 = arith.constant 0 : i32
    %c0_i32_0 = arith.constant 0 : i32
    return %arg0, %c0_i32 : i32, i32
  }
}

</mosaic_0001>

<bundles_post_ra>
// kernel: tpu_custom_call.1
= control target key start
LH: loop header
LB: loop body
LE: loop exit
PB: predicated region body
PF: predicated region fallthrough
CT: control target
= control target key end

     0   :  { %s1815_s0 = inlined_call_operand.hbm [shape: f32[16,8,32], index: 0, kind: input, shape index: {}]   ;;  %s1816_s1 = inlined_call_operand.vmem [shape: f32[16,8], index: 1, kind: input, shape index: {}]   ;;  %s1817_s2 = inlined_call_operand.vmem [shape: f32[32,32], index: 2, kind: input, shape index: {}]   ;;  %s1818_s3 = inlined_call_operand.vmem [shape: f32[1,32], index: 3, kind: input, shape index: {}]   ;;  %s1819_s4 = inlined_call_operand.vmem [shape: f32[32,1], index: 4, kind: input, shape index: {}]   ;;  %s1820_s5 = inlined_call_operand.<no memory space> [shape: f32[1,1], index: 5, kind: input, shape index: {}]   ;;  %s1821_s6 = inlined_call_operand.hbm [shape: f32[16,32], index: 6, kind: output, shape index: {}]  }
   0x1   :  { %11 = sst [smem:[#allocation2]] %s1820_s5 }
   0x2   :  { %12 = vsyncpa [#allocation4], 0 }
   0x3   :  { %14 = vsyncpa [#allocation4 + $0x1], 0 }
   0x4   :  { %15 = vsyncpa [#allocation5], 0 }
   0x5   :  { %17 = vsyncpa [#allocation5 + $0x1], 0  ;;  %s1450_s23 = smov 0   ;;  %s1452_s24 = smov 0  }
   0x6   :  { %s1454_s25 = smov 0   ;;  %s1456_s26 = smov 0  }
   0x7 LB: > { %s1471_s5 = sadd.s32 4294967295, %s1405_s26   ;;  %s1110_s27 = sadd.s32 4294967294, %s1405_s26   ;;  %s1405_s26 = sphi %s1456_s26, %s1834_s26   ;;  %s1401_s25 = sphi %s1454_s25, %s1833_s25   ;;  %s1397_s24 = sphi %s1452_s24, %s1832_s24   ;;  %s1393_s23 = sphi %s1450_s23, %s1831_s23  }
   0x8   : > { %s1475_s28 = sadd.s32 1, %s1405_s26   ;;  %s30_s29 = sadd.s32 1, %s1401_s25 }
   0x9   : > { %s27_s30 = ssub.s32 %s1405_s26, %s1475_s28  ;;  %p37_p0 = scmp.ne.s32.totalorder %s1401_s25, %s1397_s24 }
   0xa   : > { %p28_p1 = scmp.eq.s32.totalorder %s27_s30, 0  ;;  %p38_p2 = scmp.eq.s32.totalorder %s1405_s26, 0 }
   0xb   : > { %p43_p3 = scmp.ne.s32.totalorder %s1397_s24, %s1393_s23  ;;  %p44_p4 = scmp.eq.s32.totalorder %s1471_s5, 0 }
   0xc   : > { %s1487_s7 = scalar_select %p28_p1, %s1401_s25, %s30_s29  }
   0xd   : > { %p1489_p5 = por %p38_p2, %p37_p0  ;;  %p1493_p6 = por %p44_p4, %p43_p3 }
   0xe   : > { %p177_p7 = scmp.eq.s32.totalorder %s1471_s5, 1  ;;  %p183_p8 = scmp.eq.s32.totalorder %s1110_s27, 1 }
   0xf   : > { %p1234_p10 = scmp.lt.s32.totalorder %s1405_s26, 2  ;;  %s215_s12 = sand.u32 1, %s1401_s25  }
  0x10   : > { %p1500_p11 = por %p177_p7, %p37_p0  ;;  %p1504_p12 = por %p183_p8, %p43_p3 }
  0x11   : > { %s1141_s13 = sshll.u32 %s1405_s26, 10  ;;  %s1113_s14 = sshll.u32 %s215_s12, 6 }
  0x12   : > { %s1825_s10 = scalar_select %p1500_p11, 1, 0 }
  0x13   : > { %s1826_s11 = scalar_select %p1504_p12, 1, 0 }
  0x14   : > { %s1513_s17 = scalar_lea.hbm %s1815_s0, %s1141_s13  ;;  %s219_s18 = scalar_lea.vmem [#allocation3], %s1113_s14 }
  0x15   : > { %s226_s19 = sshll.u32 %s219_s18, 4  ;;  %p1517_p13 = pnand %p1234_p10, %p1489_p5  ;;  %s1521_s19 = int_to_ptr.vmem [resolvable:$true] %s226_s19 }
  0x16   : > { %s1523_s21 = scalar_lea.sflag [#allocation4], %s215_s12  ;;  %s1309_s22 = scalar_lea.hbm %s1513_s17, 1024 }
  0x17   : > { %p1310_p0 = scmp.ne.s32.totalorder %s1513_s17, %s1309_s22  ;;  %p1311_p1 = pneg %p1517_p13 }
  0x18   : > { %s1314_s30 = scalar_lea.hbm %s1815_s0, 2048  ;;  %p1315_p4 = scmp.lt.u32.totalorder %s1513_s17, %s1815_s0 }
  0x19   : > { %p1312_p2 = pnand %p1311_p1, %p1310_p0  ;;  %p1316_p5 = scmp.lt.u32.totalorder %s1314_s30, %s1309_s22 }
  0x1a   : > { %p1318_p8 = scmp.lt.u32.totalorder %s1309_s22, %s1513_s17 }
  0x1b   : > { %p1313_p3 = pneg %p1312_p2  ;;  %p1317_p7 = por %p1316_p5, %p1315_p4 }
  0x1d   : > { %p1319_p10 = por %p1318_p8, %p1317_p7 }
  0x1f   : > { %p1320_p9 = pnand %p1319_p10, %p1313_p3 }
  0x21   : > { %1323 = shalt.err (!%p1320_p9)
}
  0x22   : > { %s1324_s12 = scalar_lea.vmem %s1521_s19, 1024  ;;  %s1407_s14 = smov [#allocation3]  }
  0x23   : > { %p1325_p0 = scmp.ne.s32.totalorder %s1521_s19, %s1324_s12  ;;  %s1329_s15 = sshll.u32 %s1407_s14, 4  ;;  %s1330_s15 = int_to_ptr.vmem [resolvable:$false] %s1329_s15 }
  0x24   : > { %s1331_s16 = scalar_lea.vmem %s1330_s15, 2048  ;;  %p1332_p11 = scmp.lt.s32.totalorder %s1521_s19, %s1330_s15 }
  0x25   : > { %p1327_p2 = pnand %p1325_p0, %p1311_p1  ;;  %p1333_p4 = scmp.lt.s32.totalorder %s1331_s16, %s1324_s12 }
  0x27   : > { %p1328_p12 = pneg %p1327_p2  ;;  %p1334_p5 = por %p1333_p4, %p1332_p11 }
  0x29   : > { %p1335_p7 = pnand %p1334_p5, %p1328_p12 }
  0x2b   : > { %1338 = shalt.err (!%p1335_p7)
}
  0x2c   : > { %s1408_s18 = smov 128   ;;  %s1409_s22 = smov 8  }
  0x2d   : > { %1229 = dma.hbm_to_vmem [thread:$0]  (!%p1517_p13), %s1513_s17, 1024, %s1521_s19, %s1523_s21, %s1408_s18, %s1408_s18, %s1409_s22  }
  0x2e   : > { %p1116_p9 = scmp.ge.s32.totalorder %s1405_s26, 1  ;;  %p241_p1 = scmp.lt.s32.totalorder %s1405_s26, 3 }
  0x30   : > { %p242_p3 = pnand %p1116_p9, %p241_p1 }
  0x31   : > { %s1554_s27 = sand.u32 (!%p242_p3), 1, %s1397_s24  }
  0x32   : > { %245 = sbr.rel (%p242_p3) target bundleno = 1154 (0x482), region = 44  ;;  %s1117_s29 = sshll.u32 (!%p242_p3), %s1554_s27, 6 }
  0x33   : > { %s248_s30 = scalar_lea.sflag (!%p242_p3), [#allocation4], %s1554_s27  ;;  %s251_s8 = scalar_lea.vmem (!%p242_p3), [#allocation3], %s1117_s29 }
  0x39   : > { %1384 = dma.done.wait (%p1493_p6), %s248_s30, 1024  }
  0x3a   : > { %1386 = vsyncadd (%p1493_p6), %s248_s30, 4294966272  ;;  %vm309_vm0 = vcmask 261120   ;;  %v298_v0 = vld [vmem:[%s1817_s2] sm:$0xff]  ;;  %v299_v1 = vld [vmem:[%s1817_s2 + $0x8] sm:$0xff]  ;;  %v1410_v45 = vmov 0   ;;  %s580_s21 = sld [smem:[#allocation2]]  ;;  %v622_v63 = vlaneseq }
  0x3b   : > { %v300_v2 = vld [vmem:[%s1817_s2 + $0x10] sm:$0xff]  ;;  %v1206_v3 = vpack.c.bf16 %v299_v1, %v298_v0  ;;  %v301_v4 = vld [vmem:[%s1817_s2 + $0x18] sm:$0xff]  ;;  %v1574_v5 = vld [vmem:[%s251_s8] sm:$0xff]  ;;  %1271 = vset.pattern.permute.xlu0 %v1410_v45  ;;  %1272 = vset.pattern.permute.xlu1 %v1410_v45  ;;  %p285_p6 = scmp.lt.s32.totalorder %s1471_s5, 1  ;;  %vm656_vm1 = vcmask 1041409   ;;  %vm658_vm2 = vcmask 1042434  }
  0x3c   : > { %v1210_v6 = vpack.c.bf16 %v301_v4, %v300_v2  ;;  %1174 = vmatprep.mubr.msk.f32.mxu0 %vm309_vm0, %v1574_v5  ;;  %v1578_v7 = vld [vmem:[%s251_s8 + $0x8] sm:$0xff]  ;;  %v1580_v8 = vld [vmem:[%s251_s8 + $0x10] sm:$0xff]  ;;  %v1586_v9 = vld [vmem:[%s251_s8 + $0x18] sm:$0xff]  ;;  %v1654_v0 = vshrl.u32 %v622_v63, 7  ;;  %vm660_vm3 = vcmask 1043459   ;;  %vm662_vm4 = vcmask 1044484  }
  0x3d   : > { %1207 = vmatprep.subr.bf16.mxu0 %v1206_v3  ;;  %v1588_v10 = vld [vmem:[%s251_s8 + $0x20] sm:$0xff]  ;;  %v1594_v11 = vld [vmem:[%s251_s8 + $0x28] sm:$0xff]  ;;  %v1596_v12 = vld [vmem:[%s251_s8 + $0x30] sm:$0xff]  ;;  %s286_s13 = scalar_select %p285_p6, %s1471_s5, 1  ;;  %vm664_vm5 = vcmask 1045509   ;;  %vm666_vm6 = vcmask 1046534  }
  0x3e   : > { %1209 = vmatpush3.bf16.msra.mxu0 %v1206_v3  ;;  %v1602_v13 = vld [vmem:[%s251_s8 + $0x38] sm:$0xff]  ;;  %v447_v14 = vld [vmem:[%s1819_s4] sm:$0xff]  ;;  %v448_v15 = vld [vmem:[%s1819_s4 + $0x8] sm:$0xff]  ;;  %v678_v1 = vsub.s32 0, %v1654_v0  ;;  %v682_v2 = vsub.s32 1, %v1654_v0  ;;  %vm668_vm7 = vcmask 1047559  }
  0x3f   : > { %1211 = vmatprep.subr.bf16.mxu0 %v1210_v6  ;;  %v1214_v16 = vpack.c.bf16 %v448_v15, %v447_v14  ;;  %v449_v17 = vld [vmem:[%s1819_s4 + $0x10] sm:$0xff]  ;;  %v450_v18 = vld [vmem:[%s1819_s4 + $0x18] sm:$0xff]  ;;  %v1120_v20 = vld [vmem:[%s1818_s3] ss:$0 sm:$0xff]  ;;  %s1119_s12 = sshll.u32 %s286_s13, 3  ;;  %v686_v14 = vsub.s32 2, %v1654_v0 }
  0x40   : > { %v1218_v19 = vpack.c.bf16 %v450_v18, %v449_v17  ;;  %v581_v46 = vstv %s580_s21  ;;  %s288_s9 = scalar_lea.vmem %s1816_s1, %s1119_s12  ;;  %v694_v18 = vsub.s32 4, %v1654_v0  ;;  %vm671_vm8 = vcmask 64512   ;;  %s1118_s16 = sshll.u32 %s1554_s27, 3 }
  0x41   : > { %1215 = vmatprep.subr.bf16.mxu1 %v1214_v16  ;;  %v297_v3 = vld [vmem:[%s288_s9] sm:$0xff]  ;;  %s1138_s18 = sshll.u32 %s1471_s5, 7  ;;  %s283_s22 = scalar_lea.vmem [#allocation6], %s1118_s16 }
  0x42   : > { %1213 = vmatpush3.bf16.msra.mxu0 %v1210_v6  ;;  %1217 = vmatpush3.bf16.msra.mxu1 %v1214_v16  ;;  %v744_v4 = vrot.slane %v297_v3, %v678_v1  ;;  %v751_v6 = vrot.slane %v297_v3, %v682_v2  ;;  %v758_v15 = vrot.slane %v297_v3, %v686_v14  ;;  %v690_v16 = vsub.s32 3, %v1654_v0  ;;  %s1028_s29 = sshll.u32 %s283_s22, 4  ;;  %s1769_s17 = scalar_lea.hbm %s1821_s6, %s1138_s18  ;;  %s1771_s29 = int_to_ptr.vmem [resolvable:$true] %s1028_s29 }
  0x43   : > { %1219 = vmatprep.subr.bf16.mxu1 %v1218_v19  ;;  %s1015_s5 = scalar_lea.sflag [#allocation5], %s1554_s27  ;;  %s1339_s19 = scalar_lea.vmem %s1771_s29, 128 }
  0x44   : > { %v765_v17 = vrot.slane %v297_v3, %v690_v16  ;;  %p1340_p11 = scmp.ne.s32.totalorder %s1771_s29, %s1339_s19  ;;  %p1828_p12 = scmp.ne.s32.totalorder %s1825_s10, 0 }
  0x45   : > { %1175 = vmatmul.mubr.msk.f32.vlgmr.msra.gmra.mrb[0].mxu0 %vm309_vm0, %v1578_v7  ;;  %s1411_s20 = smov [#allocation6]  }
  0x46   : > { %1177 = vmatprep.mubr.msk.f32.mxu0 %vm309_vm0, %v1580_v8  ;;  %1221 = vmatpush3.bf16.msra.mxu1 %v1218_v19  ;;  %v772_v19 = vrot.slane %v297_v3, %v694_v18  ;;  %p1341_p13 = pnand %p1340_p11, %p1828_p12  ;;  %s1343_s21 = sshll.u32 %s1411_s20, 4  ;;  %s1344_s21 = int_to_ptr.vmem [resolvable:$false] %s1343_s21 }
  0x47   : > { %s1345_s13 = scalar_lea.vmem %s1344_s21, 256  ;;  %p1346_p10 = scmp.lt.s32.totalorder %s1771_s29, %s1344_s21 }
  0x48   : > { %p1342_p8 = pneg %p1341_p13  ;;  %p1347_p0 = scmp.lt.s32.totalorder %s1345_s13, %s1339_s19 }
  0x49   : > { %1178 = vmatmul.mubr.msk.f32.gmra.mrb[2].mxu0 %vm309_vm0, %v1586_v9 }
  0x4a   : > { %1180 = vmatprep.mubr.msk.f32.mxu0 %vm309_vm0, %v1588_v10  ;;  %p1348_p2 = por %p1347_p0, %p1346_p10 }
  0x4c   : > { %p1349_p4 = pnand %p1348_p2, %p1342_p8 }
  0x4d   : > { %1181 = vmatmul.mubr.msk.f32.gmra.mrb[4].mxu0 %vm309_vm0, %v1594_v11 }
  0x4e   : > { %1183 = vmatprep.mubr.msk.f32.mxu0 %vm309_vm0, %v1596_v12 }
  0x51   : > { %1184 = vmatmul.mubr.msk.f32.gmra.mrb[6].mxu0 %vm309_vm0, %v1602_v13 }
 0x118   : > { %v1176_v21 = vpop.f32.mrb[0].mxu0 }
 0x119   : > { %v406_v22 = vadd.f32 %v1176_v21, %v1120_v20  ;;  %v400_v23 = vpop.f32.mrb[1].mxu0 }
 0x11a   : > { %v401_v24 = vadd.f32 %v1120_v20, %v400_v23 }
 0x11c   : > { %1273 = vtanh.f32 %v401_v24  ;;  %v1179_v25 = vpop.f32.mrb[2].mxu0  ;;  %v706_v24 = vsub.s32 7, %v1654_v0 }
 0x11d   : > { %1275 = vtanh.f32 %v406_v22  ;;  %v416_v26 = vadd.f32 %v1179_v25, %v1120_v20  ;;  %v410_v27 = vpop.f32.mrb[3].mxu0  ;;  %v702_v22 = vsub.s32 6, %v1654_v0 }
 0x11e   : > { %v411_v28 = vadd.f32 %v1120_v20, %v410_v27  ;;  %v793_v25 = vrot.slane %v297_v3, %v706_v24 }
 0x11f   : > { %v786_v23 = vrot.slane %v297_v3, %v702_v22 }
 0x120   : > { %1277 = vtanh.f32 %v411_v28  ;;  %v1182_v29 = vpop.f32.mrb[4].mxu0 }
 0x121   : > { %1279 = vtanh.f32 %v416_v26  ;;  %v426_v30 = vadd.f32 %v1182_v29, %v1120_v20  ;;  %v420_v31 = vpop.f32.mrb[5].mxu0  ;;  %v623_v26 = vand.u32 127, %v622_v63 }
 0x122   : > { %v421_v32 = vadd.f32 %v1120_v20, %v420_v31 }
 0x123   : > { %1281 = vtanh.f32 %v426_v30  ;;  %v1679_v28 = vsub.s32 %v623_v26, %v1654_v0 }
 0x124   : > { %1283 = vtanh.f32 %v421_v32  ;;  %v1185_v33 = vpop.f32.mrb[6].mxu0 }
 0x125   : > { %v436_v34 = vadd.f32 %v1185_v33, %v1120_v20  ;;  %v430_v35 = vpop.f32.mrb[7].mxu0 }
 0x126   : > { %v1274_v36 = vpop.eup %1273  ;;  %v431_v37 = vadd.f32 %v1120_v20, %v430_v35  ;;  %v698_v20 = vsub.s32 5, %v1654_v0 }
 0x127   : > { %v1276_v38 = vpop.eup %1275  ;;  %1285 = vtanh.f32 %v436_v34  ;;  %1194 = vmatprep.mubr.msk.f32.mxu1 %vm309_vm0, %v1274_v36 }
 0x128   : > { %1287 = vtanh.f32 %v431_v37  ;;  %1195 = vmatmul.mubr.msk.f32.vlgmr.msra.gmra.mrb[0].mxu1 %vm309_vm0, %v1276_v38  ;;  %v779_v21 = vrot.slane %v297_v3, %v698_v20 }
 0x12a   : > { %v1278_v39 = vpop.eup %1277 }
 0x12b   : > { %v1280_v40 = vpop.eup %1279  ;;  %1197 = vmatprep.mubr.msk.f32.mxu1 %vm309_vm0, %v1278_v39 }
 0x12c   : > { %1198 = vmatmul.mubr.msk.f32.gmra.mrb[2].mxu1 %vm309_vm0, %v1280_v40 }
 0x12d   : > { %v1282_v41 = vpop.eup %1281 }
 0x12e   : > { %v1284_v42 = vpop.eup %1283 }
 0x12f   : > { %1200 = vmatprep.mubr.msk.f32.mxu1 %vm309_vm0, %v1284_v42 }
 0x130   : > { %1201 = vmatmul.mubr.msk.f32.gmra.mrb[4].mxu1 %vm309_vm0, %v1282_v41 }
 0x131   : > { %v1286_v43 = vpop.eup %1285 }
 0x132   : > { %v1288_v44 = vpop.eup %1287 }
 0x133   : > { %1203 = vmatprep.mubr.msk.f32.mxu1 %vm309_vm0, %v1288_v44 }
 0x134   : > { %1204 = vmatmul.mubr.msk.f32.gmra.mrb[6].mxu1 %vm309_vm0, %v1286_v43 }
 0x1fb   : > { %v1196_v47 = vpop.f32.mrb[0].mxu1 }
 0x1fc   : > { %v1629_v48 = vadd.f32 %v1196_v47, %v581_v46  ;;  %v541_v49 = vpop.f32.mrb[1].mxu1 }
 0x1fd   : > { %v1632_v51 = vadd.f32 %v581_v46, %v541_v49 }
 0x1fe   : > { %602 = vperm.xlu0 %1271, %v1629_v48  }
 0x1ff   : > { %v1199_v50 = vpop.f32.mrb[2].mxu1 }
 0x200   : > { %v1634_v52 = vadd.f32 %v1199_v50, %v581_v46  ;;  %v551_v53 = vpop.f32.mrb[3].mxu1 }
 0x201   : > { %v1638_v55 = vadd.f32 %v581_v46, %v551_v53 }
 0x202   : > { %599 = vperm.xlu0 %1271, %v1632_v51   ;;  %608 = vperm.xlu1 %1272, %v1634_v52  }
 0x203   : > { %v1202_v54 = vpop.f32.mrb[4].mxu1 }
 0x204   : > { %v561_v56 = vpop.f32.mrb[5].mxu1  ;;  %v1644_v59 = vadd.f32 %v1202_v54, %v581_v46 }
 0x205   : > { %v1640_v57 = vadd.f32 %v581_v46, %v561_v56 }
 0x206   : > { %605 = vperm.xlu1 %1272, %v1638_v55  }
 0x207   : > { %611 = vperm.xlu0 %1271, %v1640_v57   ;;  %v1205_v58 = vpop.f32.mrb[6].mxu1 }
 0x208   : > { %v571_v60 = vpop.f32.mrb[7].mxu1  ;;  %v1650_v62 = vadd.f32 %v1205_v58, %v581_v46 }
 0x209   : > { %v1646_v61 = vadd.f32 %v581_v46, %v571_v60 }
 0x20a   : > { %614 = vperm.xlu1 %1272, %v1644_v59  }
 0x20b   : > { %617 = vperm.xlu0 %1271, %v1646_v61  }
 0x20e   : > { %620 = vperm.xlu1 %1272, %v1650_v62  }
 0x212   : > { %746 = vbcast.lane.b32.xlu1 %v744_v4, 256 }
 0x216   : > { %753 = vbcast.lane.b32.xlu1 %v751_v6, 256 }
 0x21a   : > { %760 = vbcast.lane.b32.xlu1 %v758_v15, 256 }
 0x21e   : > { %767 = vbcast.lane.b32.xlu1 %v765_v17, 256 }
 0x222   : > { %774 = vbcast.lane.b32.xlu1 %v772_v19, 256 }
 0x226   : > { %781 = vbcast.lane.b32.xlu1 %v779_v21, 256 }
 0x22a   : > { %788 = vbcast.lane.b32.xlu1 %v786_v23, 256 }
 0x22e   : > { %795 = vbcast.lane.b32.xlu1 %v793_v25, 256 }
 0x27d   : > { %v603_v27 = vpop.permute.xlu0 %602 }
 0x27e   : > { %v631_v32 = vrot.slane %v603_v27, %v1679_v28 }
 0x281   : > { %v600_v29 = vpop.permute.xlu0 %599  ;;  %v609_v30 = vpop.permute.xlu1 %608 }
 0x282   : > { %v627_v31 = vrot.slane %v600_v29, %v1679_v28  ;;  %v639_v37 = vrot.slane %v609_v30, %v1679_v28 }
 0x284   : > { %v657_v36 = vsel %vm656_vm1, %v631_v32, %v627_v31 }
 0x285   : > { %v606_v33 = vpop.permute.xlu1 %605 }
 0x286   : > { %v635_v34 = vrot.slane %v606_v33, %v1679_v28  ;;  %v612_v35 = vpop.permute.xlu0 %611 }
 0x287   : > { %v643_v38 = vrot.slane %v612_v35, %v1679_v28 }
 0x288   : > { %v659_v39 = vsel %vm658_vm2, %v635_v34, %v657_v36 }
 0x289   : > { %v661_v40 = vsel %vm660_vm3, %v639_v37, %v659_v39  ;;  %v615_v41 = vpop.permute.xlu1 %614 }
 0x28a   : > { %v663_v42 = vsel %vm662_vm4, %v643_v38, %v661_v40  ;;  %v647_v43 = vrot.slane %v615_v41, %v1679_v28  ;;  %v618_v44 = vpop.permute.xlu0 %617 }
 0x28b   : > { %v651_v45 = vrot.slane %v618_v44, %v1679_v28 }
 0x28c   : > { %v665_v46 = vsel %vm664_vm5, %v647_v43, %v663_v42 }
 0x28d   : > { %v621_v47 = vpop.permute.xlu1 %620  ;;  %v667_v50 = vsel %vm666_vm6, %v651_v45, %v665_v46 }
 0x28e   : > { %v655_v49 = vrot.slane %v621_v47, %v1679_v28 }
 0x290   : > { %v669_v53 = vsel %vm668_vm7, %v655_v49, %v667_v50 }
 0x291   : > { %v672_v54 = vsel %vm671_vm8, %v669_v53, -inf  ;;  %v747_v56 = vpop.permute.xlu1 %746 }
 0x292   : > { %673 = vmax.xlane.f32.xlu0 %v672_v54 }
 0x295   : > { %v754_v58 = vpop.permute.xlu1 %753 }
 0x299   : > { %v761_v60 = vpop.permute.xlu1 %760 }
 0x29d   : > { %v768_v3 = vpop.permute.xlu1 %767 }
 0x2a1   : > { %v775_v26 = vpop.permute.xlu1 %774 }
 0x31f   : > { %v1697_v63 = vpop.xlane.xlu0 %673 }
 0x320   : > { %v683_v4 = vrot.slane %v1697_v63, %v682_v2  ;;  %v679_v6 = vrot.slane %v1697_v63, %v678_v1  ;;  %v687_v15 = vrot.slane %v1697_v63, %v686_v14  ;;  %v707_v17 = vrot.slane %v1697_v63, %v706_v24 }
 0x321   : > { %v691_v23 = vrot.slane %v1697_v63, %v690_v16  ;;  %v695_v1 = vrot.slane %v1697_v63, %v694_v18  ;;  %v703_v18 = vrot.slane %v1697_v63, %v702_v22 }
 0x322   : > { %v717_v19 = vsub.f32 %v1629_v48, %v683_v4  ;;  %v716_v21 = vsub.f32 %v1632_v51, %v679_v6  ;;  %v718_v25 = vsub.f32 %v1638_v55, %v687_v15  ;;  %v723_v27 = vsub.f32 %v1650_v62, %v707_v17  ;;  %v782_v48 = vpop.permute.xlu1 %781 }
 0x323   : > { %v719_v30 = vsub.f32 %v1634_v52, %v691_v23  ;;  %v720_v16 = vsub.f32 %v1640_v57, %v695_v1  ;;  %v699_v55 = vrot.slane %v1697_v63, %v698_v20  ;;  %v722_v57 = vsub.f32 %v1646_v61, %v703_v18 }
 0x324   : > { %v726_v2 = vmul.f32 1.442695, %v717_v19  ;;  %v724_v29 = vmul.f32 1.442695, %v716_v21  ;;  %v728_v14 = vmul.f32 1.442695, %v718_v25 }
 0x325   : > { %v738_v24 = vmul.f32 1.442695, %v723_v27  ;;  %v730_v51 = vmul.f32 1.442695, %v719_v30  ;;  %v732_v52 = vmul.f32 1.442695, %v720_v16  ;;  %v721_v62 = vsub.f32 %v1644_v59, %v699_v55 }
 0x326   : > { %1289 = vpow2.f32 %v726_v2  ;;  %v789_v31 = vpop.permute.xlu1 %788  ;;  %v736_v39 = vmul.f32 1.442695, %v722_v57 }
 0x327   : > { %1291 = vpow2.f32 %v724_v29  ;;  %v734_v33 = vmul.f32 1.442695, %v721_v62 }
 0x328   : > { %1293 = vpow2.f32 %v728_v14  ;;  %v888_v14 = vsub.f32 0.0, %v1697_v63 }
 0x329   : > { %1295 = vpow2.f32 %v738_v24 }
 0x32a   : > { %1297 = vpow2.f32 %v730_v51  ;;  %v796_v38 = vpop.permute.xlu1 %795  ;;  %v889_v24 = vmul.f32 1.442695, %v888_v14 }
 0x32b   : > { %1299 = vpow2.f32 %v732_v52 }
 0x32c   : > { %1301 = vpow2.f32 %v734_v33 }
 0x32d   : > { %1303 = vpow2.f32 %v736_v39 }
 0x32e   : > { %1305 = vpow2.f32 %v889_v24 }
 0x330   : > { %v1290_v32 = vpop.eup %1289 }
 0x331   : > { %v1292_v34 = vpop.eup %1291  ;;  %v806_v35 = vmul.f32 %v1290_v32, %v754_v58 }
 0x332   : > { %v1294_v36 = vpop.eup %1293  ;;  %v805_v20 = vmul.f32 %v1292_v34, %v747_v56 }
 0x333   : > { %v1296_v37 = vpop.eup %1295  ;;  %825 = vperm.xlu1 %1272, %v806_v35   ;;  %v807_v59 = vmul.f32 %v1294_v36, %v761_v60 }
 0x334   : > { %822 = vperm.xlu0 %1271, %v805_v20   ;;  %v1298_v0 = vpop.eup %1297  ;;  %v812_v40 = vmul.f32 %v1296_v37, %v796_v38 }
 0x335   : > { %v808_v22 = vmul.f32 %v1298_v0, %v768_v3  ;;  %v1300_v41 = vpop.eup %1299 }
 0x336   : > { %v809_v61 = vmul.f32 %v1300_v41, %v775_v26  ;;  %v1302_v42 = vpop.eup %1301 }
 0x337   : > { %828 = vperm.xlu1 %1272, %v807_v59   ;;  %v810_v43 = vmul.f32 %v1302_v42, %v782_v48  ;;  %v1304_v44 = vpop.eup %1303 }
 0x338   : > { %843 = vperm.xlu0 %1271, %v812_v40   ;;  %v811_v45 = vmul.f32 %v1304_v44, %v789_v31  ;;  %v1306_v36 = vpop.eup %1305 }
 0x33b   : > { %831 = vperm.xlu1 %1272, %v808_v22   ;;  %v891_v22 = vmul.f32 1e-08, %v1306_v36 }
 0x33f   : > { %834 = vperm.xlu1 %1272, %v809_v61  }
 0x343   : > { %837 = vperm.xlu1 %1272, %v810_v43  }
 0x347   : > { %840 = vperm.xlu1 %1272, %v811_v45  }
 0x3b2   : > { %v826_v46 = vpop.permute.xlu1 %825 }
 0x3b3   : > { %v823_v50 = vpop.permute.xlu0 %822  ;;  %v852_v54 = vrot.slane %v826_v46, %v1679_v28  ;;  %v902_v48 = vmul.f32 %v826_v46, %v1578_v7 }
 0x3b4   : > { %v848_v56 = vrot.slane %v823_v50, %v1679_v28  ;;  %v901_v51 = vmul.f32 %v823_v50, %v1574_v5 }
 0x3b5   : > { %v916_v62 = vsel %vm309_vm0, %v902_v48, 0.0 }
 0x3b6   : > { %v829_v47 = vpop.permute.xlu1 %828  ;;  %v877_v6 = vsel %vm656_vm1, %v852_v54, %v848_v56  ;;  %v909_v18 = vsel %vm309_vm0, %v901_v51, 0.0 }
 0x3b7   : > { %v856_v58 = vrot.slane %v829_v47, %v1679_v28  ;;  %v844_v19 = vpop.permute.xlu0 %843  ;;  %v903_v16 = vmul.f32 %v829_v47, %v1580_v8  ;;  %v917_v8 = vrot.slane %v916_v62, 4  ;;  %v910_v32 = vrot.slane %v909_v18, 4 }
 0x3b8   : > { %v876_v27 = vrot.slane %v844_v19, %v1679_v28  ;;  %v908_v63 = vmul.f32 %v844_v19, %v1602_v13 }
 0x3b9   : > { %v878_v17 = vsel %vm658_vm2, %v856_v58, %v877_v6  ;;  %v923_v31 = vsel %vm309_vm0, %v903_v16, 0.0  ;;  %v918_v20 = vadd.f32 %v917_v8, %v916_v62  ;;  %v911_v37 = vadd.f32 %v910_v32, %v909_v18 }
 0x3ba   : > { %v832_v49 = vpop.permute.xlu1 %831  ;;  %v924_v33 = vrot.slane %v923_v31, 4 }
 0x3bb   : > { %v860_v60 = vrot.slane %v832_v49, %v1679_v28  ;;  %v919_v41 = vrot.slane %v918_v20, 2  ;;  %v912_v61 = vrot.slane %v911_v37, 2 }
 0x3bc   : > { %v925_v39 = vadd.f32 %v924_v33, %v923_v31 }
 0x3bd   : > { %v879_v21 = vsel %vm660_vm3, %v860_v60, %v878_v17  ;;  %v913_v54 = vadd.f32 %v912_v61, %v911_v37 }
 0x3be   : > { %v835_v53 = vpop.permute.xlu1 %834  ;;  %v926_v44 = vrot.slane %v925_v39, 2 }
 0x3bf   : > { %v864_v4 = vrot.slane %v835_v53, %v1679_v28  ;;  %v905_v55 = vmul.f32 %v835_v53, %v1588_v10  ;;  %v920_v53 = vadd.f32 %v919_v41, %v918_v20  ;;  %v914_v17 = vrot.slane %v913_v54, 1 }
 0x3c0   : > { %v927_v56 = vadd.f32 %v926_v44, %v925_v39 }
 0x3c1   : > { %v880_v25 = vsel %vm662_vm4, %v864_v4, %v879_v21 }
 0x3c2   : > { %v838_v3 = vpop.permute.xlu1 %837  ;;  %v928_v19 = vrot.slane %v927_v56, 1 }
 0x3c3   : > { %v868_v15 = vrot.slane %v838_v3, %v1679_v28  ;;  %v906_v52 = vmul.f32 %v838_v3, %v1594_v11  ;;  %v958_v11 = vsel %vm309_vm0, %v908_v63, 0.0 }
 0x3c4   : > { %v959_v38 = vrot.slane %v958_v11, 4 }
 0x3c5   : > { %v881_v2 = vsel %vm664_vm5, %v868_v15, %v880_v25  ;;  %v944_v10 = vsel %vm309_vm0, %v906_v52, 0.0  ;;  %v921_v15 = vrot.slane %v920_v53, 1 }
 0x3c6   : > { %v841_v23 = vpop.permute.xlu1 %840  ;;  %v945_v13 = vrot.slane %v944_v10, 4  ;;  %v960_v42 = vadd.f32 %v959_v38, %v958_v11 }
 0x3c7   : > { %v872_v26 = vrot.slane %v841_v23, %v1679_v28  ;;  %v904_v28 = vmul.f32 %v832_v49, %v1586_v9  ;;  %v907_v5 = vmul.f32 %v841_v23, %v1596_v12  ;;  %v937_v9 = vsel %vm309_vm0, %v905_v55, 0.0 }
 0x3c8   : > { %v938_v35 = vrot.slane %v937_v9, 4  ;;  %v946_v40 = vadd.f32 %v945_v13, %v944_v10  ;;  %v961_v58 = vrot.slane %v960_v42, 2 }
 0x3c9   : > { %v882_v29 = vsel %vm666_vm6, %v872_v26, %v881_v2  ;;  %v930_v7 = vsel %vm309_vm0, %v904_v28, 0.0  ;;  %v951_v34 = vsel %vm309_vm0, %v907_v5, 0.0  ;;  %v922_v2 = vadd.f32 %v921_v15, %v920_v53 }
 0x3ca   : > { %v883_v30 = vsel %vm668_vm7, %v876_v27, %v882_v29  ;;  %v931_v57 = vrot.slane %v930_v7, 4  ;;  %v952_v59 = vrot.slane %v951_v34, 4  ;;  %v939_v0 = vadd.f32 %v938_v35, %v937_v9 }
 0x3cb   : > { %v885_v1 = vsel %vm671_vm8, %v883_v30, 0.0  ;;  %v947_v50 = vrot.slane %v946_v40, 2  ;;  %v962_v21 = vadd.f32 %v961_v58, %v960_v42  ;;  %v915_v29 = vadd.f32 %v914_v17, %v913_v54 }
 0x3cc   : > { %886 = vadd.xlane.f32.xlu1 %v885_v1  ;;  %v932_v12 = vadd.f32 %v931_v57, %v930_v7  ;;  %v953_v46 = vadd.f32 %v952_v59, %v951_v34  ;;  %v940_v49 = vrot.slane %v939_v0, 2  ;;  %v929_v1 = vadd.f32 %v928_v19, %v927_v56 }
 0x3cd   : > { %v948_v6 = vadd.f32 %v947_v50, %v946_v40  ;;  %v963_v14 = vrot.slane %v962_v21, 1 }
 0x3ce   : > { %v933_v45 = vrot.slane %v932_v12, 2  ;;  %v954_v3 = vrot.slane %v953_v46, 2  ;;  %v941_v4 = vadd.f32 %v940_v49, %v939_v0 }
 0x3cf   : > { %v949_v27 = vrot.slane %v948_v6, 1  ;;  %v964_v32 = vadd.f32 %v963_v14, %v962_v21 }
 0x3d0   : > { %v934_v60 = vadd.f32 %v933_v45, %v932_v12  ;;  %v955_v25 = vadd.f32 %v954_v3, %v953_v46  ;;  %v942_v26 = vrot.slane %v941_v4, 1 }
 0x3d1   : > { %v950_v62 = vadd.f32 %v949_v27, %v948_v6 }
 0x3d2   : > { %v935_v23 = vrot.slane %v934_v60, 1  ;;  %v956_v48 = vrot.slane %v955_v25, 1  ;;  %v943_v52 = vadd.f32 %v942_v26, %v941_v4 }
 0x3d4   : > { %v936_v24 = vadd.f32 %v935_v23, %v934_v60  ;;  %v957_v9 = vadd.f32 %v956_v48, %v955_v25 }
 0x459   : > { %v887_v43 = vpop.xlane.xlu1 %886 }
 0x45a   : > { %v892_v47 = vadd.f32 %v891_v22, %v887_v43 }
 0x45c   : > { %1307 = vrcp.f32 %v892_v47 }
 0x466   : > { %v1308_v30 = vpop.eup %1307 }
 0x467   : > { %v967_v51 = vrot.slane %v1308_v30, 1  ;;  %v968_v16 = vrot.slane %v1308_v30, 2  ;;  %v969_v28 = vrot.slane %v1308_v30, 3  ;;  %v970_v55 = vrot.slane %v1308_v30, 4 }
 0x468   : > { %v971_v18 = vrot.slane %v1308_v30, 5  ;;  %v972_v63 = vrot.slane %v1308_v30, 6  ;;  %v973_v31 = vrot.slane %v1308_v30, 7  ;;  %v982_v33 = vmul.f32 %v1308_v30, %v915_v29 }
 0x469   : > { %v983_v7 = vmul.f32 %v967_v51, %v922_v2  ;;  %v984_v5 = vmul.f32 %v968_v16, %v929_v1  ;;  %v985_v8 = vmul.f32 %v969_v28, %v936_v24  ;;  %v986_v10 = vmul.f32 %v970_v55, %v943_v52 }
 0x46a   : > { %v987_v11 = vmul.f32 %v971_v18, %v950_v62  ;;  %v988_v35 = vmul.f32 %v972_v63, %v957_v9  ;;  %v989_v13 = vmul.f32 %v973_v31, %v964_v32 }
 0x46b   : > { %v998_v57 = vrot.slane %v983_v7, 7  ;;  %v1000_v34 = vrot.slane %v984_v5, 6  ;;  %v1002_v20 = vrot.slane %v985_v8, 5  ;;  %v1004_v38 = vrot.slane %v986_v10, 4 }
 0x46c   : > { %v1006_v12 = vrot.slane %v987_v11, 3  ;;  %v1008_v0 = vrot.slane %v988_v35, 2  ;;  %v1010_v22 = vrot.slane %v989_v13, 1 }
 0x46d   : > { %v999_v36 = vsel %vm656_vm1, %v998_v57, %v982_v33 }
 0x46e   : > { %v1001_v37 = vsel %vm658_vm2, %v1000_v34, %v999_v36 }
 0x46f   : > { %v1003_v39 = vsel %vm660_vm3, %v1002_v20, %v1001_v37 }
 0x470   : > { %v1005_v59 = vsel %vm662_vm4, %v1004_v38, %v1003_v39 }
 0x471   : > { %v1007_v40 = vsel %vm664_vm5, %v1006_v12, %v1005_v59 }
 0x472   : > { %v1009_v41 = vsel %vm666_vm6, %v1008_v0, %v1007_v40 }
 0x473   : > { %v1011_v61 = vsel %vm668_vm7, %v1010_v22, %v1009_v41 }
 0x474   : > { %1013 = vst.msk [vmem:[%s283_s22] sm:$0xff] %vm309_vm0, %v1011_v61 }
 0x475   : > { %1352 = shalt.err (!%p1349_p4)
}
 0x476   : > { %s1353_s27 = scalar_lea.hbm %s1769_s17, 128  ;;  %s1357_s15 = scalar_lea.hbm %s1821_s6, 256 }
 0x477   : > { %p1354_p5 = scmp.ne.s32.totalorder %s1769_s17, %s1353_s27  ;;  %p1358_p1 = scmp.lt.u32.totalorder %s1769_s17, %s1821_s6 }
 0x478   : > { %p1359_p3 = scmp.lt.u32.totalorder %s1357_s15, %s1353_s27  ;;  %p1361_p11 = scmp.lt.u32.totalorder %s1353_s27, %s1769_s17 }
 0x479   : > { %p1355_p7 = pnand %p1354_p5, %p1828_p12 }
 0x47a   : > { %p1360_p6 = por %p1359_p3, %p1358_p1 }
 0x47b   : > { %p1356_p9 = pneg %p1355_p7 }
 0x47c   : > { %p1362_p13 = por %p1361_p11, %p1360_p6 }
 0x47e   : > { %p1363_p8 = pnand %p1362_p13, %p1356_p9 }
 0x480   : > { %1366 = shalt.err (!%p1363_p8)
}
 0x481   : > { %1224 = dma.vmem_to_hbm [thread:$0]  (%p1828_p12), %s1771_s29, 128, %s1769_s17, %s1015_s5  }
 0x482 PF: > { %s1040_s18 = sand.u32 1, %s1393_s23   ;;  %p1829_p10 = scmp.ne.s32.totalorder %s1826_s11, 0 }
 0x483   : > { %p1830_p0 = scmp.ge.s32.totalorder %s1405_s26, 2  ;;  %s1041_s22 = scalar_lea.sflag [#allocation5], %s1040_s18 }
 0x485   : > { %p1231_p2 = pnand %p1830_p0, %p1829_p10 }
 0x487   : > { %1388 = dma.done.wait (!%p1231_p2), %s1041_s22, 128  }
 0x488   : > { %1390 = vsyncadd (!%p1231_p2), %s1041_s22, 4294967168  ;;  %p20_p4 = scmp.ge.s32.totalorder %s1475_s28, 4   ;;  %s1831_s23 = smov %s1397_s24 }
 0x489   : > { %s1832_s24 = smov %s1401_s25  ;;  %s1833_s25 = smov %s1487_s7 }
 0x48a   : > { %s1834_s26 = smov %s1475_s28  ;;  %22 = sbr.rel (!%p20_p4) target bundleno = 7 (0x7), region = 92 }
 0x491   :  { %1046 = vsyncpa [#allocation4], 1 }
 0x492   :  { %1048 = vsyncpa [#allocation4 + $0x1], 1 }
 0x493   :  { %1049 = vsyncpa [#allocation5], 1 }
 0x494   :  { %1051 = vsyncpa [#allocation5 + $0x1], 1 }

</bundles_post_ra>
